<compile_context>
chip_gen: v6e
topology: v6e:2x2x1
jax: 0.10.0
libtpu: 0.0.40
codegen_flags: <defaults>
</compile_context>

<pallas_src>
import functools

import jax
import jax.numpy as jnp
from jax.experimental import pallas as pl
from jax.experimental.pallas import tpu as pltpu


def _round_up(x, m):
    return ((x + m - 1) // m) * m


def _conv3x3_kernel(x_cur_ref, x_halo_ref, w_ref, o_ref, *, wp):
    """One (C_out, TILE) output tile of the 3x3 / stride-1 / pad-1 conv.

    x_cur_ref : (C_in, TILE)     current window of the flattened padded input
    x_halo_ref: (C_in, HB)       halo window starting right after the current one
    w_ref     : (C_out, 9*C_in)  folded conv weight (tap-major along K)
    o_ref     : (C_out, TILE)    lane-dense output tile
    """
    tile = o_ref.shape[-1]
    # Only HB extra lanes are appended (not a full second tile).
    x = jnp.concatenate([x_cur_ref[...], x_halo_ref[...]], axis=-1)  # (C_in, TILE+HB)
    # Stack the 9 static tap slices along K -> one big-K MXU matmul.
    taps = [x[:, kh * wp + kw: kh * wp + kw + tile]
            for kh in range(3) for kw in range(3)]
    slab = jnp.concatenate(taps, axis=0)                             # (9*C_in, TILE)
    o_ref[...] = jnp.dot(w_ref[...], slab,
                         preferred_element_type=jnp.float32).astype(o_ref.dtype)


def overlap_patch_embed(x, weight, *, tile_l=None, dot_dtype=jnp.bfloat16):
    """3x3 / stride-1 / pad-1 / bias-free conv (== OverlapPatchEmbed.proj).

    x:      (B, C_in, H, W)     NCHW
    weight: (C_out, C_in, 3, 3) OIHW
    returns (B, C_out, H, W)    in x.dtype (matmul accumulates in f32)
    """
    B, C_in, H, W = x.shape
    C_out, C_in_w, kh_, kw_ = weight.shape
    assert (C_in_w, kh_, kw_) == (C_in, 3, 3)

    out_dtype = x.dtype
    op_dtype = jnp.dtype(dot_dtype) if dot_dtype is not None else jnp.dtype(x.dtype)
    in_bytes = op_dtype.itemsize
    out_bytes = jnp.dtype(out_dtype).itemsize

    Wp = W + 2
    L_pos = H * Wp                          # flat output positions we keep
    HB = _round_up(2 * Wp + 2, 128)         # halo width >= largest tap offset

    # ---- generation / shape aware tiling & VMEM limit ----------------------
    try:
        vmem_cap = int(pltpu.get_tpu_info().vmem_capacity_bytes)
    except Exception:
        vmem_cap = 64 * 1024 * 1024         # conservative (v7x per-TensorCore)
    if tile_l is None:
        budget = min(vmem_cap // 2, 48 * 1024 * 1024)
        per_lane = (2 * C_in * in_bytes      # double-buffered current window
                    + 2 * C_out * out_bytes  # double-buffered output tile
                    + C_in * in_bytes        # concat temp
                    + 9 * C_in * in_bytes    # folded-K slab
                    + C_out * 4)             # f32 matmul result
        fixed = (2 * C_in * HB * in_bytes             # halo buffers
                 + 2 * 9 * C_in * C_out * in_bytes)   # weight buffers
        tile_l = max(HB, (budget - fixed) // per_lane)
        tile_l = min(tile_l, 8192)
    tile = max(_round_up(tile_l, HB), HB)    # tile must be a multiple of HB
    tile = min(tile, _round_up(L_pos, HB))   # never bigger than the work
    n_tiles = pl.cdiv(L_pos, tile)
    L_out = n_tiles * tile
    hb_per_tile = tile // HB

    # ---- single fused pad: the +1 flat shift == asymmetric (2,0) W-pad -----
    L_src = n_tiles * tile + HB              # current windows + last halo window
    rows_total = pl.cdiv(L_src, Wp)          # 1 top pad row + H real rows + bottom pad
    bottom = rows_total - 1 - H
    assert bottom >= 2                       # conv needs >=1 zero row below; always true
    x_src = jnp.pad(x, ((0, 0), (0, 0), (1, bottom), (2, 0)))
    x_src = x_src.reshape(B, C_in, rows_total * Wp).astype(op_dtype)  # cast hoisted

    # Weight OIHW -> (C_out, 9*C_in), K ordered tap-major then channel,
    # matching the slab built in the kernel.
    w_fold = jnp.transpose(weight, (0, 2, 3, 1)).reshape(C_out, 9 * C_in)
    w_fold = w_fold.astype(op_dtype)

    kernel = functools.partial(_conv3x3_kernel, wp=Wp)

    # Rough per-step VMEM need -> explicit (clamped) scoped limit.
    vmem_need = (2 * C_in * tile * in_bytes + 2 * C_in * HB * in_bytes
                 + 2 * C_out * tile * out_bytes
                 + 2 * w_fold.size * in_bytes
                 + C_in * (tile + HB) * in_bytes
                 + 9 * C_in * tile * in_bytes
                 + C_out * tile * 4)
    vmem_limit = int(min(max(2 * vmem_need, 32 * 1024 * 1024),
                         int(vmem_cap * 0.9)))

    flops = 2 * B * L_out * 9 * C_in * C_out
    bytes_accessed = (B * C_in * (L_out + n_tiles * HB) * in_bytes   # cur + halo reads
                      + w_fold.size * in_bytes                       # resident weight
                      + B * C_out * L_out * out_bytes)               # output writes

    out_full = pl.pallas_call(
        kernel,
        out_shape=jax.ShapeDtypeStruct((B, C_out, L_out), out_dtype),
        grid=(B, n_tiles),
        in_specs=[
            # Current TILE-wide window of the flattened padded input.
            pl.BlockSpec((None, C_in, tile), lambda b, i: (b, 0, i)),
            # Narrow HB-wide halo window starting at (i+1)*tile.
            pl.BlockSpec((None, C_in, HB),
                         lambda b, i: (b, 0, (i + 1) * hb_per_tile)),
            # Resident folded weight.
            pl.BlockSpec((C_out, 9 * C_in), lambda b, i: (0, 0)),
        ],
        out_specs=pl.BlockSpec((None, C_out, tile), lambda b, i: (b, 0, i)),
        compiler_params=pltpu.CompilerParams(
            dimension_semantics=("parallel", "parallel"),
            vmem_limit_bytes=vmem_limit,
        ),
        cost_estimate=pl.CostEstimate(
            flops=flops, transcendentals=0, bytes_accessed=bytes_accessed),
    )(x_src, x_src, w_fold)

    # Output is already channel-major; drop padded columns / tail with a cheap
    # reshape + column slice (no transpose).
    out = out_full[:, :, :L_pos].reshape(B, C_out, H, Wp)[:, :, :, 1:1 + W]
    return out


if __name__ == "__main__":
    B, C_in, H, W = 2, 4, 16, 16
    embed_dim = 32

    key = jax.random.PRNGKey(0)
    kx, kw = jax.random.split(key)
    x = jax.random.normal(kx, (B, C_in, H, W), dtype=jnp.float32)
    # Deterministic synthetic Conv2d weight (OIHW), roughly kaiming-scaled.
    fan_in = C_in * 3 * 3
    weight = jax.random.normal(kw, (embed_dim, C_in, 3, 3), dtype=jnp.float32) * (
        1.0 / jnp.sqrt(fan_in)
    )

    # Reference conv to validate semantics.
    ref = jax.lax.conv_general_dilated(
        x, weight, window_strides=(1, 1), padding="SAME",
        dimension_numbers=("NCHW", "OIHW", "NCHW"),
    )

    # 1) Multi-tile path (3 flat tiles per batch) with f32 operands: tight check
    #    of the tiling / halo / folded-K plumbing.
    out_f32 = jax.block_until_ready(
        overlap_patch_embed(x, weight, tile_l=128, dot_dtype=None))
    assert out_f32.shape == (B, embed_dim, H, W)
    assert jnp.allclose(out_f32, ref, atol=2e-4, rtol=2e-4), "mismatch (f32 path)"

    # 2) Default fast path: auto tile, bf16 MXU operands, f32 accumulation.
    out_bf16 = jax.block_until_ready(overlap_patch_embed(x, weight))
    assert out_bf16.shape == (B, embed_dim, H, W)
    assert jnp.allclose(out_bf16, ref, atol=5e-2, rtol=5e-2), "mismatch (bf16 path)"

    print("KERNEL_OK")
</pallas_src>

<mosaic_0001>
module attributes {stable_mosaic.version = 11 : i64} {
  func.func @_conv3x3_kernel(%arg0: i32, %arg1: i32, %arg2: memref<1x4x128xf32, #tpu.memory_space<vmem>>, %arg3: memref<1x4x128xf32, #tpu.memory_space<vmem>>, %arg4: memref<32x36xf32, #tpu.memory_space<vmem>>, %arg5: memref<1x32x128xf32, #tpu.memory_space<vmem>>) attributes {dimension_semantics = [#tpu.dimension_semantics<parallel>, #tpu.dimension_semantics<parallel>], iteration_bounds = array<i64: 2, 3>, scalar_prefetch = 0 : i64, scratch_operands = 0 : i64, tpu.core_type = #tpu.core_type<tc>, window_params = [{transform_indices = @transform_0, window_bounds = array<i64: 1, 4, 128>}, {transform_indices = @transform_1, window_bounds = array<i64: 1, 4, 128>}, {pipeline_mode = #tpu.pipeline_mode<synchronous>, transform_indices = @transform_2, window_bounds = array<i64: 32, 36>}, {transform_indices = @transform_3, window_bounds = array<i64: 1, 32, 128>}]} {
    %c0 = arith.constant 0 : index
    %c0_0 = arith.constant 0 : index
    %c0_1 = arith.constant 0 : index
    %0 = vector.load %arg2[%c0, %c0_0, %c0_1] : memref<1x4x128xf32, #tpu.memory_space<vmem>>, vector<1x4x128xf32>
    %1 = vector.shape_cast %0 : vector<1x4x128xf32> to vector<4x128xf32>
    %c0_2 = arith.constant 0 : index
    %c0_3 = arith.constant 0 : index
    %c0_4 = arith.constant 0 : index
    %2 = vector.load %arg3[%c0_2, %c0_3, %c0_4] : memref<1x4x128xf32, #tpu.memory_space<vmem>>, vector<1x4x128xf32>
    %3 = vector.shape_cast %2 : vector<1x4x128xf32> to vector<4x128xf32>
    %4 = tpu.concatenate %1, %3 in 1 : vector<4x128xf32>, vector<4x128xf32> -> vector<4x256xf32>
    %5 = vector.extract_strided_slice %4 {offsets = [0, 0], sizes = [4, 128], strides = [1, 1]} : vector<4x256xf32> to vector<4x128xf32>
    %6 = vector.extract_strided_slice %4 {offsets = [0, 1], sizes = [4, 128], strides = [1, 1]} : vector<4x256xf32> to vector<4x128xf32>
    %7 = vector.extract_strided_slice %4 {offsets = [0, 2], sizes = [4, 128], strides = [1, 1]} : vector<4x256xf32> to vector<4x128xf32>
    %8 = vector.extract_strided_slice %4 {offsets = [0, 18], sizes = [4, 128], strides = [1, 1]} : vector<4x256xf32> to vector<4x128xf32>
    %9 = vector.extract_strided_slice %4 {offsets = [0, 19], sizes = [4, 128], strides = [1, 1]} : vector<4x256xf32> to vector<4x128xf32>
    %10 = vector.extract_strided_slice %4 {offsets = [0, 20], sizes = [4, 128], strides = [1, 1]} : vector<4x256xf32> to vector<4x128xf32>
    %11 = vector.extract_strided_slice %4 {offsets = [0, 36], sizes = [4, 128], strides = [1, 1]} : vector<4x256xf32> to vector<4x128xf32>
    %12 = vector.extract_strided_slice %4 {offsets = [0, 37], sizes = [4, 128], strides = [1, 1]} : vector<4x256xf32> to vector<4x128xf32>
    %13 = vector.extract_strided_slice %4 {offsets = [0, 38], sizes = [4, 128], strides = [1, 1]} : vector<4x256xf32> to vector<4x128xf32>
    %14 = tpu.concatenate %5, %6, %7, %8, %9, %10, %11, %12, %13 in 0 : vector<4x128xf32>, vector<4x128xf32>, vector<4x128xf32>, vector<4x128xf32>, vector<4x128xf32>, vector<4x128xf32>, vector<4x128xf32>, vector<4x128xf32>, vector<4x128xf32> -> vector<36x128xf32>
    %c0_5 = arith.constant 0 : index
    %c0_6 = arith.constant 0 : index
    %15 = vector.load %arg4[%c0_5, %c0_6] : memref<32x36xf32, #tpu.memory_space<vmem>>, vector<32x36xf32>
    %cst = arith.constant dense<0.000000e+00> : vector<32x128xf32>
    %16 = tpu.matmul %15, %14, %cst {dimension_numbers = #tpu.dot_dimension_numbers<[1], [0], [0], [1], [0, 0, 1, 1], [], []>} : vector<32x36xf32>, vector<36x128xf32>, vector<32x128xf32> -> vector<32x128xf32>
    %c0_7 = arith.constant 0 : index
    %c0_8 = arith.constant 0 : index
    %c0_9 = arith.constant 0 : index
    %17 = vector.load %arg5[%c0_7, %c0_8, %c0_9] : memref<1x32x128xf32, #tpu.memory_space<vmem>>, vector<1x32x128xf32>
    %18 = vector.shape_cast %17 : vector<1x32x128xf32> to vector<32x128xf32>
    %19 = vector.shape_cast %16 : vector<32x128xf32> to vector<1x32x128xf32>
    tpu.vector_store %arg5[%c0_7, %c0_8, %c0_9], %19 {strides = array<i32>} : memref<1x32x128xf32, #tpu.memory_space<vmem>>, vector<1x32x128xf32>,
    return
  }
  func.func @transform_0(%arg0: i32, %arg1: i32) -> (i32, i32, i32) {
    %c0_i32 = arith.constant 0 : i32
    %c0_i32_0 = arith.constant 0 : i32
    return %arg0, %c0_i32, %arg1 : i32, i32, i32
  }
  func.func @transform_1(%arg0: i32, %arg1: i32) -> (i32, i32, i32) {
    %c1_i32 = arith.constant 1 : i32
    %0 = arith.addi %arg1, %c1_i32 : i32
    %c1_i32_0 = arith.constant 1 : i32
    %1 = arith.muli %0, %c1_i32_0 : i32
    %c0_i32 = arith.constant 0 : i32
    %c0_i32_1 = arith.constant 0 : i32
    return %arg0, %c0_i32, %1 : i32, i32, i32
  }
  func.func @transform_2(%arg0: i32, %arg1: i32) -> (i32, i32) {
    %c0_i32 = arith.constant 0 : i32
    %c0_i32_0 = arith.constant 0 : i32
    %c0_i32_1 = arith.constant 0 : i32
    return %c0_i32, %c0_i32_0 : i32, i32
  }
  func.func @transform_3(%arg0: i32, %arg1: i32) -> (i32, i32, i32) {
    %c0_i32 = arith.constant 0 : i32
    %c0_i32_0 = arith.constant 0 : i32
    return %arg0, %c0_i32, %arg1 : i32, i32, i32
  }
}

</mosaic_0001>

<bundles_post_ra>
// kernel: tpu_custom_call.1
= control target key start
LH: loop header
LB: loop body
LE: loop exit
PB: predicated region body
PF: predicated region fallthrough
CT: control target
= control target key end

     0   :  { %s1313_s0 = inlined_call_operand.hbm [shape: f32[2,4,522], index: 0, kind: input, shape index: {}]   ;;  %s1314_s1 = inlined_call_operand.hbm [shape: f32[2,4,522], index: 1, kind: input, shape index: {}]   ;;  %s1315_s2 = inlined_call_operand.hbm [shape: f32[32,36], index: 2, kind: input, shape index: {}]   ;;  %s1316_s3 = inlined_call_operand.hbm [shape: f32[2,32,384], index: 3, kind: output, shape index: {}]  }
   0x1   :  { %1327 = sst [smem:[#allocation19_spill]] %s1315_s2 }
   0x2   :  { %1328 = sst [smem:[#allocation20_spill]] %s1316_s3 }
   0x3   :  { %8 = vsyncpa [#allocation3], 0 }
   0x4   :  { %10 = vsyncpa [#allocation3 + $0x1], 0 }
   0x5   :  { %11 = vsyncpa [#allocation6], 0 }
   0x6   :  { %13 = vsyncpa [#allocation6 + $0x1], 0 }
   0x7   :  { %14 = vsyncpa [#allocation4], 0 }
   0x8   :  { %16 = vsyncpa [#allocation4 + $0x1], 0  ;;  %s1016_s12 = smov 0   ;;  %s1018_s13 = smov 0  }
   0x9   :  { %s1020_s14 = smov 0   ;;  %s1022_s15 = smov 0  }
   0xa   :  { %s1024_s16 = smov 0   ;;  %s1026_s17 = smov 0  }
   0xb   :  { %s1028_s18 = smov 0   ;;  %s1030_s19 = smov 0  }
   0xc   :  { %s1032_s20 = smov 0   ;;  %s1034_s21 = smov 0  }
   0xd   :  { %s1036_s22 = smov 0  }
   0xe LB: > { %1329 = sst [smem:[#allocation13_spill]] %s957_s17  ;;  %s1072_s23 = sadd.s32 4294967295, %s977_s22   ;;  %s977_s22 = sphi %s1036_s22, %s22_s22   ;;  %s973_s21 = sphi %s1034_s21, %s1356_s21   ;;  %s969_s20 = sphi %s1032_s20, %s1363_s20   ;;  %s965_s19 = sphi %s1030_s19, %s1354_s19   ;;  %s961_s18 = sphi %s1028_s18, %s1362_s18   ;;  %s957_s17 = sphi %s1026_s17, %s1353_s17   ;;  %s953_s16 = sphi %s1024_s16, %s1361_s16   ;;  %s949_s15 = sphi %s1022_s15, %s1360_s15   ;;  %s945_s14 = sphi %s1020_s14, %s1359_s14   ;;  %s941_s13 = sphi %s1018_s13, %s1358_s13   ;;  %s937_s12 = sphi %s1016_s12, %s1357_s12  }
   0xf   : > { %1330 = sst [smem:[#allocation14_spill]] %s973_s21  ;;  %p577_p0 = scmp.ge.s32.totalorder %s977_s22, 1 }
  0x10   : > { %p1325_p1 = scmp.eq.s32.totalorder %s1072_s23, 0  ;;  %p146_p2 = scmp.lt.s32.totalorder %s977_s22, 7 }
  0x11   : > { %s979_s25 = smov [#allocation7]  }
  0x12   : > { %p1077_p3 = pnand %p577_p0, %p146_p2  ;;  %s158_s26 = sshll.u32 %s979_s25, 4  ;;  %s159_s26 = int_to_ptr.vmem [resolvable:$true] %s158_s26 }
  0x13   : > { %s777_s27 = scalar_lea.vmem %s159_s26, 512  ;;  %p785_p10 = scmp.lt.s32.totalorder %s159_s26, %s159_s26 }
  0x14   : > { %p645_p4 = pneg %p1077_p3  ;;  %p778_p7 = scmp.ne.s32.totalorder %s159_s26, %s777_s27 }
  0x15   : > { %p786_p11 = scmp.lt.s32.totalorder %s777_s27, %s777_s27 }
  0x16   : > { %p646_p5 = pnand %p645_p4, %p1325_p1 }
  0x17   : > { %p787_p12 = por %p786_p11, %p785_p10 }
  0x18   : > { %p768_p6 = pneg %p646_p5 }
  0x1a   : > { %p780_p8 = pnand %p778_p7, %p768_p6 }
  0x1c   : > { %p781_p9 = pneg %p780_p8 }
  0x1e   : > { %p788_p13 = pnand %p787_p12, %p781_p9 }
  0x20   : > { %791 = shalt.err (!%p788_p13)
}
  0x21   : > { %s980_s28 = smov 128   ;;  %s981_s29 = smov 8  }
  0x22   : > { %s1332_s2 = sld [smem:[#allocation19_spill]]  ;;  %s576_s5 = sadd.s32 4294967294, %s977_s22  }
  0x23   : > { %s31_s6 = sadd.s32 1, %s969_s20  ;;  %s34_s7 = sadd.s32 1, %s973_s21 }
  0x24   : > { %p32_p0 = scmp.ge.s32.totalorder %s31_s6, 3  ;;  %s43_s8 = sadd.s32 1, %s957_s17 }
  0x25   : > { %p50_p2 = scmp.ne.s32.totalorder %s957_s17, %s953_s16  ;;  %p1326_p4 = scmp.eq.s32.totalorder %s977_s22, 0 }
  0x26   : > { %s1095_s9 = scalar_select %p32_p0, 0, %s31_s6  }
  0x27   : > { %s1365_s7 = smov (!%p32_p0, %s34_s7), %s973_s21  ;;  %p56_p7 = scmp.ne.s32.totalorder %s953_s16, %s949_s15 }
  0x28   : > { %648 = dma.hbm_to_vmem [thread:$0]  (!%p646_p5), %s1332_s2, 512, %s159_s26, [#allocation6], %s980_s28, %s980_s28, %s981_s29  }
  0x29   : > { %1333 = sst [smem:[#allocation15_spill]] %s1095_s9  ;;  %s39_s10 = ssub.s32 %s969_s20, %s1095_s9 }
  0x2a   : > { %p1105_p5 = por %p1326_p4, %p50_p2  ;;  %p36_p6 = scmp.ge.s32.totalorder %s1365_s7, 2 }
  0x2b   : > { %s67_s25 = sadd.s32 1, %s1095_s9  ;;  %p133_p8 = scmp.eq.s32.totalorder %s1072_s23, 5 }
  0x2c   : > { %s1367_s7 = smov (%p36_p6, %s1365_s7), 0  ;;  %p1120_p9 = por %p1325_p1, %p56_p7 }
  0x2d   : > { %1335 = sst [smem:[#allocation16_spill]] %s1367_s7  ;;  %s69_s27 = ssub.s32 %s31_s6, %s67_s25 }
  0x2e   : > { %s38_s28 = ssub.s32 %s973_s21, %s1367_s7  ;;  %p1129_p10 = por %p133_p8, %p50_p2 }
  0x2f   : > { %s40_s30 = sor.u32 %s39_s10, %s38_s28  ;;  %s70_s4 = sor.u32 %s69_s27, %s38_s28 }
  0x30   : > { %s1337_s29 = scalar_select %p1129_p10, 1, 0 }
  0x31   : > { %p41_p11 = scmp.eq.s32.totalorder %s40_s30, 0  ;;  %p1133_p12 = scmp.eq.s32.totalorder %s70_s4, 0 }
  0x32   : > { %1338 = sst [smem:[#allocation17_spill]] %s1337_s29  ;;  %p139_p13 = scmp.eq.s32.totalorder %s576_s5, 5 }
  0x33   : > { %p1324_p0 = scmp.lt.s32.totalorder %s977_s22, 6  ;;  %s172_s25 = sand.u32 1, %s957_s17  }
  0x34   : > { %s1139_s9 = scalar_select %p41_p11, %s957_s17, %s43_s8  }
  0x35   : > { %p1144_p6 = por %p139_p13, %p56_p7  ;;  %s580_s7 = sshll.u32 %s172_s25, 2 }
  0x36   : > { %1340 = sst [smem:[#allocation18_spill]] %s1139_s9  ;;  %s633_s3 = smul.u32 5, %s973_s21 }
  0x37   : > { %s176_s29 = scalar_lea.vmem [#allocation2], %s580_s7  ;;  %p1154_p2 = pnand %p1324_p0, %p1105_p5 }
  0x38   : > { %s185_s10 = sshll.u32 %s176_s29, 4  ;;  %s181_s5 = sadd.s32 %s969_s20, %s633_s3  ;;  %s186_s10 = int_to_ptr.vmem [resolvable:$true] %s185_s10 }
  0x39   : > { %s581_s8 = sshll.u32 %s181_s5, 6  ;;  %s173_s7 = scalar_lea.sflag [#allocation3], %s172_s25 }
  0x3a   : > { %s183_s4 = scalar_lea.hbm %s1313_s0, %s581_s8  ;;  %s1165_s21 = scalar_lea.hbm %s1314_s1, %s581_s8 }
  0x3b   : > { %p794_p7 = pneg %p1154_p2  ;;  %s805_s11 = scalar_lea.vmem %s186_s10, 64 }
  0x3c   : > { %p806_p5 = scmp.ne.s32.totalorder %s186_s10, %s805_s11  ;;  %s982_s29 = smov [#allocation2]  }
  0x3d   : > { %s810_s3 = sshll.u32 %s982_s29, 4  ;;  %s811_s3 = int_to_ptr.vmem [resolvable:$false] %s810_s3 }
  0x3e   : > { %p808_p8 = pnand %p806_p5, %p794_p7  ;;  %s812_s5 = scalar_lea.vmem %s811_s3, 128 }
  0x3f   : > { %p813_p13 = scmp.lt.s32.totalorder %s186_s10, %s811_s3  ;;  %p814_p0 = scmp.lt.s32.totalorder %s812_s5, %s805_s11 }
  0x40   : > { %p809_p11 = pneg %p808_p8 }
  0x41   : > { %p815_p1 = por %p814_p0, %p813_p13 }
  0x43   : > { %p816_p4 = pnand %p815_p1, %p809_p11 }
  0x45   : > { %819 = shalt.err (!%p816_p4)
}
  0x46   : > { %652 = dma.hbm_to_vmem [thread:$0]  (!%p1154_p2), %s183_s4, 64, %s186_s10, %s173_s7  }
  0x47   : > { %s73_s17 = sadd.s32 1, %s945_s14  ;;  %p80_p0 = scmp.ne.s32.totalorder %s945_s14, %s941_s13 }
  0x48   : > { %s1177_s9 = scalar_select %p1133_p12, %s945_s14, %s73_s17  }
  0x49   : > { %p1343_p1 = scmp.eq.s32.totalorder %s977_s22, 0  ;;  %p86_p7 = scmp.ne.s32.totalorder %s941_s13, %s937_s12 }
  0x4a   : > { %s192_s25 = sand.u32 1, %s977_s22   ;;  %s194_s27 = sand.u32 1, %s945_s14  }
  0x4b   : > { %p82_p4 = por %p80_p0, %p1343_p1  ;;  %p1344_p5 = scmp.eq.s32.totalorder %s1072_s23, 0 }
  0x4c   : > { %s582_s28 = sshll.u32 %s194_s27, 2  ;;  %s496_s30 = scalar_lea.hbm %s1165_s21, 64 }
  0x4d   : > { %p1187_p8 = por %p86_p7, %p1344_p5  ;;  %p1346_p11 = scmp.lt.s32.totalorder %s977_s22, 6 }
  0x4e   : > { %s196_s2 = scalar_lea.vmem [#allocation5], %s582_s28  ;;  %s193_s7 = scalar_lea.sflag [#allocation6], %s192_s25 }
  0x4f   : > { %p1194_p13 = pnand %p1346_p11, %p82_p4  ;;  %s206_s4 = sshll.u32 %s196_s2, 4  ;;  %s207_s4 = int_to_ptr.vmem [resolvable:$true] %s206_s4 }
  0x50   : > { %s833_s12 = scalar_lea.vmem %s207_s4, 64  ;;  %s983_s11 = smov [#allocation5]  }
  0x51   : > { %p822_p12 = pneg %p1194_p13  ;;  %p834_p2 = scmp.ne.s32.totalorder %s207_s4, %s833_s12 }
  0x52   : > { %s838_s29 = sshll.u32 %s983_s11, 4  ;;  %s839_s29 = int_to_ptr.vmem [resolvable:$false] %s838_s29 }
  0x53   : > { %p836_p0 = pnand %p834_p2, %p822_p12  ;;  %s840_s21 = scalar_lea.vmem %s839_s29, 128 }
  0x54   : > { %p841_p7 = scmp.lt.s32.totalorder %s207_s4, %s839_s29  ;;  %p842_p4 = scmp.lt.s32.totalorder %s840_s21, %s833_s12 }
  0x55   : > { %p837_p1 = pneg %p836_p0 }
  0x56   : > { %p843_p5 = por %p842_p4, %p841_p7 }
  0x58   : > { %p844_p11 = pnand %p843_p5, %p837_p1 }
  0x5a   : > { %847 = shalt.err (!%p844_p11)
}
  0x5b   : > { %655 = dma.hbm_to_vmem [thread:$0]  (!%p1194_p13), %s496_s30, 64, %s207_s4, %s193_s7  }
  0x5c   : > { %215 = sbr.rel (%p1077_p3) target bundleno = 463 (0x1cf), region = 32  ;;  %s1205_s3 = sand.u32 (!%p1077_p3), 1, %s953_s16  }
  0x5d   : > { %s585_s5 = sshll.u32 (!%p1077_p3), %s1205_s3, 2  ;;  %s218_s17 = scalar_lea.sflag (!%p1077_p3), [#allocation3], %s1205_s3 }
  0x5e   : > { %s221_s25 = scalar_lea.vmem (!%p1077_p3), [#allocation2], %s585_s5 }
  0x61   : > { %920 = dma.done.wait (%p1120_p9), %s218_s17, 64  }
  0x62   : > { %922 = vsyncadd (%p1120_p9), %s218_s17, 4294967232  ;;  %s226_s27 = sand.u32 1, %s1072_s23   ;;  %s228_s24 = sand.u32 1, %s941_s13  }
  0x63   : > { %s586_s28 = sshll.u32 %s228_s24, 2  ;;  %s227_s30 = scalar_lea.sflag [#allocation6], %s226_s27 }
  0x64   : > { %s230_s10 = scalar_lea.vmem [#allocation5], %s586_s28 }
  0x65   : > { %924 = dma.done.wait (%p1187_p8), %s227_s30, 64  }
  0x66   : > { %926 = vsyncadd (%p1187_p8), %s227_s30, 4294967232  ;;  %p1348_p3 = scmp.eq.s32.totalorder %s1072_s23, 0 }
  0x68   : > { %928 = dma.done.wait (%p1348_p3), [#allocation6], 512   ;;  %p1349_p13 = pmov %p1348_p3 }
  0x69   : > { %v1223_v0 = vld [vmem:[%s221_s25] sm:$0xf]  ;;  %s984_s26 = smov 92   ;;  %s985_s2 = smov 90   ;;  %v264_v1 = vld [vmem:[%s230_s10] sm:$0xf] }
  0x6a   : > { %930 = vsyncadd (%p1349_p13), [#allocation6], 4294966784  ;;  %304 = vrot.lane.b32.xlu1 %v1223_v0, %s984_s26  ;;  %318 = vrot.lane.b32.xlu0 %v1223_v0, %s985_s2  ;;  %v268_v2 = vrot.slane %v264_v1, 4  ;;  %v267_v3 = vrot.slane %v1223_v0, 4  ;;  %s986_s8 = smov 91   ;;  %s987_s4 = smov 109  }
  0x6b   : > { %s988_s23 = smov 108   ;;  %v329_v4 = vld [vmem:[#allocation7] sm:$0xff]  ;;  %vm333_vm0 = vcmask 293888   ;;  %v331_v5 = vld [vmem:[#allocation7 + $0x10] sm:$0xff]  ;;  %s989_s7 = smov 126   ;;  %vm322_vm1 = vcmask 736256  }
  0x6c   : > { %617 = vmatprep.mubr.msk.f32.mxu0 %vm333_vm0, %v329_v4  ;;  %620 = vmatprep.mubr.msk.f32.mxu1 %vm333_vm0, %v331_v5  ;;  %s990_s12 = smov 110   ;;  %s991_s11 = smov 127   ;;  %vm324_vm2 = vcmask 1043456   ;;  %vm308_vm3 = vcmask 752640   ;;  %vm315_vm4 = vcmask 744448   ;;  %vm294_vm5 = vcmask 891904  }
  0x6d   : > { %vm301_vm6 = vcmask 883712   ;;  %vm280_vm7 = vcmask 1031168   ;;  %vm287_vm8 = vcmask 900096   ;;  %vm273_vm9 = vcmask 1039360   ;;  %v330_v34 = vld [vmem:[#allocation7 + $0x8] sm:$0xff]  ;;  %v332_v35 = vld [vmem:[#allocation7 + $0x18] sm:$0xff] }
  0x6e   : > { %306 = vrot.lane.b32.xlu1 %v264_v1, %s984_s26  ;;  %320 = vrot.lane.b32.xlu0 %v264_v1, %s985_s2  ;;  %s588_s29 = sshll.u32 %s1205_s3, 5  ;;  %s634_s21 = smul.u32 12, %s965_s19 }
  0x6f   : > { %s261_s17 = scalar_lea.vmem [#allocation8], %s588_s29  ;;  %s1351_s10 = sld [smem:[#allocation20_spill]] }
  0x70   : > { %s449_s5 = sadd.s32 %s961_s18, %s634_s21  ;;  %s452_s27 = sshll.u32 %s261_s17, 4  ;;  %s1246_s27 = int_to_ptr.vmem [resolvable:$true] %s452_s27 }
  0x71   : > { %s595_s24 = sshll.u32 %s449_s5, 7  ;;  %s438_s18 = scalar_lea.sflag [#allocation4], %s1205_s3 }
  0x72   : > { %313 = vrot.lane.b32.xlu1 %v268_v2, %s986_s8  ;;  %311 = vrot.lane.b32.xlu0 %v267_v3, %s986_s8  ;;  %s849_s19 = scalar_lea.vmem %s1246_s27, 512  ;;  %s992_s2 = smov [#allocation8]  }
  0x73   : > { %p850_p9 = scmp.ne.s32.totalorder %s1246_s27, %s849_s19  ;;  %s853_s8 = sshll.u32 %s992_s2, 4  ;;  %s854_s8 = int_to_ptr.vmem [resolvable:$false] %s853_s8 }
  0x74   : > { %p856_p2 = scmp.lt.s32.totalorder %s1246_s27, %s854_s8 }
  0x75   : > { %s1251_s26 = scalar_lea.hbm %s1351_s10, %s595_s24  ;;  %p851_p8 = pnand %p850_p9, %p1129_p10 }
  0x76   : > { %292 = vrot.lane.b32.xlu1 %v264_v1, %s987_s4  ;;  %290 = vrot.lane.b32.xlu0 %v1223_v0, %s987_s4  ;;  %s855_s4 = scalar_lea.vmem %s854_s8, 1024 }
  0x77   : > { %p852_p12 = pneg %p851_p8  ;;  %p857_p0 = scmp.lt.s32.totalorder %s855_s4, %s849_s19 }
  0x79   : > { %p858_p1 = por %p857_p0, %p856_p2 }
  0x7a   : > { %299 = vrot.lane.b32.xlu1 %v268_v2, %s988_s23  ;;  %297 = vrot.lane.b32.xlu0 %v267_v3, %s988_s23 }
  0x7b   : > { %p859_p7 = pnand %p858_p1, %p852_p12 }
  0x7e   : > { %278 = vrot.lane.b32.xlu1 %v264_v1, %s989_s7  ;;  %276 = vrot.lane.b32.xlu0 %v1223_v0, %s989_s7 }
  0x82   : > { %285 = vrot.lane.b32.xlu1 %v268_v2, %s990_s12  ;;  %283 = vrot.lane.b32.xlu0 %v267_v3, %s990_s12 }
  0x86   : > { %271 = vrot.lane.b32.xlu1 %v268_v2, %s991_s11  ;;  %269 = vrot.lane.b32.xlu0 %v267_v3, %s991_s11 }
  0xdc   : > { %v305_v6 = vpop.permute.xlu1 %304  ;;  %v319_v7 = vpop.permute.xlu0 %318 }
  0xe0   : > { %v307_v8 = vpop.permute.xlu1 %306  ;;  %v321_v9 = vpop.permute.xlu0 %320 }
  0xe1   : > { %v323_v10 = vsel %vm322_vm1, %v319_v7, %v321_v9  ;;  %v309_v13 = vsel %vm308_vm3, %v305_v6, %v307_v8 }
  0xe2   : > { %607 = vmatprep.subr.msk.mxu0 %vm324_vm2, %v323_v10  ;;  %623 = vmatprep.subr.msk.mxu1 %vm324_vm2, %v323_v10 }
  0xe3   : > { %608 = vmatpush3.msk.msra.mxu0 %vm324_vm2, %v323_v10  ;;  %628 = vmatpush3.msk.msra.mxu1 %vm324_vm2, %v323_v10 }
  0xe4   : > { %v314_v11 = vpop.permute.xlu1 %313  ;;  %v312_v12 = vpop.permute.xlu0 %311 }
  0xe5   : > { %v316_v14 = vsel %vm315_vm4, %v312_v12, %v314_v11 }
  0xe6   : > { %v328_v15 = vsel %vm324_vm2, %v309_v13, %v316_v14 }
  0xe7   : > { %609 = vmatprep.subr.mxu0 %v328_v15  ;;  %624 = vmatprep.subr.mxu1 %v328_v15 }
  0xe8   : > { %v293_v16 = vpop.permute.xlu1 %292  ;;  %610 = vmatpush3.msra.mxu0 %v328_v15  ;;  %629 = vmatpush3.msra.mxu1 %v328_v15  ;;  %v291_v17 = vpop.permute.xlu0 %290 }
  0xe9   : > { %v295_v20 = vsel %vm294_vm5, %v291_v17, %v293_v16 }
  0xec   : > { %v300_v18 = vpop.permute.xlu1 %299  ;;  %v298_v19 = vpop.permute.xlu0 %297 }
  0xed   : > { %v302_v21 = vsel %vm301_vm6, %v298_v19, %v300_v18 }
  0xee   : > { %v327_v22 = vsel %vm324_vm2, %v295_v20, %v302_v21 }
  0xef   : > { %611 = vmatprep.subr.mxu0 %v327_v22  ;;  %625 = vmatprep.subr.mxu1 %v327_v22 }
  0xf0   : > { %v279_v23 = vpop.permute.xlu1 %278  ;;  %612 = vmatpush3.msra.mxu0 %v327_v22  ;;  %630 = vmatpush3.msra.mxu1 %v327_v22  ;;  %v277_v24 = vpop.permute.xlu0 %276 }
  0xf1   : > { %v281_v27 = vsel %vm280_vm7, %v277_v24, %v279_v23 }
  0xf4   : > { %v286_v25 = vpop.permute.xlu1 %285  ;;  %v284_v26 = vpop.permute.xlu0 %283 }
  0xf5   : > { %v288_v28 = vsel %vm287_vm8, %v284_v26, %v286_v25 }
  0xf6   : > { %v326_v29 = vsel %vm324_vm2, %v281_v27, %v288_v28 }
  0xf7   : > { %613 = vmatprep.subr.mxu0 %v326_v29  ;;  %626 = vmatprep.subr.mxu1 %v326_v29 }
  0xf8   : > { %v272_v30 = vpop.permute.xlu1 %271  ;;  %614 = vmatpush3.msra.mxu0 %v326_v29  ;;  %631 = vmatpush3.msra.mxu1 %v326_v29  ;;  %v270_v31 = vpop.permute.xlu0 %269 }
  0xf9   : > { %v274_v32 = vsel %vm273_vm9, %v270_v31, %v272_v30 }
  0xfa   : > { %v325_v33 = vsel %vm324_vm2, %v1223_v0, %v274_v32 }
  0xfb   : > { %615 = vmatprep.subr.mxu0 %v325_v33  ;;  %627 = vmatprep.subr.mxu1 %v325_v33 }
  0xfc   : > { %616 = vmatpush3.msra.mxu0 %v325_v33  ;;  %632 = vmatpush3.msra.mxu1 %v325_v33 }
  0xfd   : > { %618 = vmatmul.mubr.msk.f32.vlgmr.msra.gmra.mxu0 %vm333_vm0, %v330_v34  ;;  %621 = vmatmul.mubr.msk.f32.vlgmr.msra.gmra.mxu1 %vm333_vm0, %v332_v35 }
 0x1bd   : > { %v619_v36 = vpop.f32.mrf.mxu0  ;;  %v622_v37 = vpop.f32.mrf.mxu1 }
 0x1be   : > { %434 = vst [vmem:[%s261_s17 + $0x8] sm:$0xff] %v619_v36  ;;  %436 = vst [vmem:[%s261_s17 + $0x18] sm:$0xff] %v622_v37 }
 0x1bf   : > { %v414_v38 = vpop.f32.mrf.mxu0  ;;  %v424_v39 = vpop.f32.mrf.mxu1 }
 0x1c0   : > { %433 = vst [vmem:[%s261_s17] sm:$0xff] %v414_v38  ;;  %435 = vst [vmem:[%s261_s17 + $0x10] sm:$0xff] %v424_v39 }
 0x1c1   : > { %862 = shalt.err (!%p859_p7)
}
 0x1c2   : > { %s863_s23 = scalar_lea.hbm %s1251_s26, 512  ;;  %s867_s11 = scalar_lea.hbm %s1351_s10, 3072 }
 0x1c3   : > { %p864_p4 = scmp.ne.s32.totalorder %s1251_s26, %s863_s23  ;;  %p868_p3 = scmp.lt.s32.totalorder %s1251_s26, %s1351_s10 }
 0x1c4   : > { %p869_p13 = scmp.lt.s32.totalorder %s867_s11, %s863_s23 }
 0x1c5   : > { %p865_p5 = pnand %p864_p4, %p1129_p10 }
 0x1c6   : > { %p870_p9 = por %p869_p13, %p868_p3 }
 0x1c7   : > { %p866_p11 = pneg %p865_p5 }
 0x1c9   : > { %p871_p8 = pnand %p870_p9, %p866_p11 }
 0x1cb   : > { %874 = shalt.err (!%p871_p8)
}
 0x1cc   : > { %s993_s5 = smov 128   ;;  %s994_s17 = smov 384  }
 0x1cd   : > { %s995_s24 = smov 8  }
 0x1ce   : > { %643 = dma.vmem_to_hbm [thread:$0]  (%p1129_p10), %s1246_s27, 512, %s1251_s26, %s438_s18, %s993_s5, %s994_s17, %s995_s24  }
 0x1cf PF: > { %p663_p12 = scmp.ge.s32.totalorder %s977_s22, 2  ;;  %s467_s28 = sand.u32 1, %s949_s15  }
 0x1d0   : > { %s468_s30 = scalar_lea.sflag [#allocation4], %s467_s28 }
 0x1d1   : > { %p657_p2 = pnand %p663_p12, %p1144_p6 }
 0x1d3   : > { %p658_p0 = pneg %p657_p2 }
 0x1d5   : > { %932 = dma.done.wait (%p658_p0), %s468_s30, 512  }
 0x1d6   : > { %934 = vsyncadd (%p658_p0), %s468_s30, 4294966784  ;;  %s22_s22 = sadd.s32 1, %s977_s22   ;;  %s1352_s3 = sld [smem:[#allocation13_spill]] }
 0x1d7   : > { %p19_p1 = scmp.ge.s32.totalorder %s22_s22, 8   ;;  %s1353_s17 = sld [smem:[#allocation18_spill]] }
 0x1d8   : > { %s1354_s19 = sld [smem:[#allocation14_spill]]  ;;  %s1357_s12 = smov %s941_s13 }
 0x1d9   : > { %s1355_s25 = sld [smem:[#allocation15_spill]]  ;;  %s1358_s13 = smov %s945_s14 }
 0x1da   : > { %s1356_s21 = sld [smem:[#allocation16_spill]]  ;;  %s1359_s14 = smov %s1177_s9 }
 0x1db   : > { %s1360_s15 = smov %s953_s16  ;;  %s1362_s18 = smov %s969_s20 }
 0x1dc   : > { %s1361_s16 = smov %s1352_s3  ;;  %21 = sbr.rel (!%p19_p1) target bundleno = 14 (0xe), region = 94 }
 0x1df   : > { %s1363_s20 = smov %s1355_s25 }
 0x1e1   :  { %473 = vsyncpa [#allocation3], 1 }
 0x1e2   :  { %475 = vsyncpa [#allocation3 + $0x1], 1 }
 0x1e3   :  { %476 = vsyncpa [#allocation6], 1 }
 0x1e4   :  { %478 = vsyncpa [#allocation6 + $0x1], 1 }
 0x1e5   :  { %479 = vsyncpa [#allocation4], 1 }
 0x1e6   :  { %481 = vsyncpa [#allocation4 + $0x1], 1 }

</bundles_post_ra>
